<compile_context>
chip_gen: v7x
topology: tpu7x:2x2x1
jax: 0.10.0
libtpu: 0.0.40
codegen_flags: <defaults>
</compile_context>

<pallas_src>
import jax
import jax.numpy as jnp
from jax.experimental import pallas as pl
from jax.experimental.pallas import tpu as pltpu


def _mingru_scan_kernel(h_ref, g_ref, tril_ref, o_ref, a_c, m_c, s_c):
    """One (batch-tile, seq-chunk) step of the carried Heinsen scan in log space.

    h_ref, g_ref, o_ref : (Tc, L) lane-dense slabs, L = Bt * D (batch folded on lanes)
    tril_ref            : (Tc, Tc) lower-triangular ones (resident; DMA'd once)
    a_c, m_c, s_c       : (1, L) VMEM carries across sequence chunks
    """
    c = pl.program_id(1)  # sequence-chunk index (innermost, "arbitrary")

    @pl.when(c == 0)
    def _():
        # New batch tile: reset the scan carry.
        a_c[...] = jnp.zeros_like(a_c)
        m_c[...] = jnp.full_like(m_c, -1e30)
        s_c[...] = jnp.zeros_like(s_c)

    hidden = h_ref[...].astype(jnp.float32)      # (Tc, L)
    gate = g_ref[...].astype(jnp.float32)        # (Tc, L)
    tril = tril_ref[...]                         # (Tc, Tc)

    # Shared-softplus gating math:  softplus(y) = relu(y) + log1p(exp(-|y|))
    tg = jnp.log1p(jnp.exp(-jnp.abs(gate)))                # shared transcendental
    log_coeffs = -(jnp.maximum(gate, 0.0) + tg)            # log(1 - z) = -softplus(gate)
    log_z = -(jnp.maximum(-gate, 0.0) + tg)                # log(z)     = -softplus(-gate)

    th = jnp.log1p(jnp.exp(-jnp.abs(hidden)))
    log_tilde_h = jnp.where(
        hidden >= 0.0,
        jnp.log(jnp.maximum(hidden, 0.0) + 0.5),           # log(relu(h) + 0.5)
        -(jnp.maximum(-hidden, 0.0) + th),                 # -softplus(-h)
    )
    log_values = log_z + log_tilde_h                       # (Tc, L)

    # Within-chunk cumulative sums on the MXU, spliced with the cross-chunk carry.
    a_star = a_c[...] + jnp.dot(tril, log_coeffs, preferred_element_type=jnp.float32)
    v = log_values - a_star
    m_new = jnp.maximum(m_c[...], jnp.max(v, axis=0, keepdims=True))   # (1, L)
    e = jnp.exp(v - m_new)
    csum = s_c[...] * jnp.exp(m_c[...] - m_new) + jnp.dot(
        tril, e, preferred_element_type=jnp.float32)                   # (Tc, L)

    # h = exp(a_star + m + log(csum)) with the log folded away (review item 1).
    o_ref[...] = (jnp.exp(a_star + m_new) * csum).astype(o_ref.dtype)

    # Carry to the next chunk of this batch tile.
    a_c[...] = a_star[-1:, :]
    m_c[...] = m_new
    s_c[...] = csum[-1:, :]


def _pick_batch_tile(B, D, max_lanes):
    """Largest batch tile Bt whose lane width Bt*D is legal and <= max_lanes."""
    if B * D <= max_lanes:
        return B                              # whole folded batch: always layout-legal
    for cand in range(B - 1, 0, -1):
        if B % cand:
            continue
        lanes = cand * D
        # A sub-extent block's lane dim must be a multiple of 128.
        if lanes <= max_lanes and lanes % 128 == 0:
            return cand
    # No legal sub-batch tile exists; fall back to the (always-legal) full extent.
    # This may exceed max_lanes; kept explicit rather than silently degrading layout.
    return B


def _pick_seq_chunk(T, max_chunk):
    """Sequence-chunk length Tc: divides T, multiple of 8 (or the full extent)."""
    if T <= max_chunk:
        return T
    for cand in range(max_chunk, 7, -1):
        if T % cand == 0 and cand % 8 == 0:
            return cand
    return T


def mingru_forward(x, w_hg, *, max_lanes=1024, max_seq_chunk=256, seq_chunk=None):
    """x: (B, T, D), w_hg: (D, 2D) (transposed Linear weight) -> (B, T, D)."""
    B, T, D = x.shape
    assert w_hg.shape == (D, 2 * D)

    # --- Projection hoisted to the wrapper (plain XLA matmul; fuses with producer).
    hg = x @ w_hg                                  # (B, T, 2D)
    hidden, gate = hg[..., :D], hg[..., D:]

    # --- Layout plumbing: fold batch onto lanes, (B, T, D) -> (T, B*D).
    # TODO(synk): at production sizes fuse these relayouts into the producer/consumer
    #             (or accept a (T, B, D) native layout) to avoid extra HBM round-trips.
    hidden_f = jnp.transpose(hidden, (1, 0, 2)).reshape(T, B * D)
    gate_f = jnp.transpose(gate, (1, 0, 2)).reshape(T, B * D)

    Bt = _pick_batch_tile(B, D, max_lanes)
    L = Bt * D
    n_b = B // Bt

    Tc = seq_chunk if seq_chunk is not None else _pick_seq_chunk(T, max_seq_chunk)
    assert T % Tc == 0 and (Tc == T or Tc % 8 == 0), "bad seq_chunk"
    n_c = T // Tc

    # Within-chunk lower-triangular ones; resident in VMEM (constant index_map).
    tril = jnp.tril(jnp.ones((Tc, Tc), dtype=jnp.float32))

    # Advisory cost: two (Tc,Tc)x(Tc,L) matmuls per step; ~7 EUP ops per element.
    flops = 4 * B * D * T * Tc
    transcendentals = 7 * B * T * D
    bytes_accessed = 3 * B * T * D * 4 + Tc * Tc * 4

    out_folded = pl.pallas_call(
        _mingru_scan_kernel,
        out_shape=jax.ShapeDtypeStruct((T, B * D), x.dtype),
        grid_spec=pltpu.PrefetchScalarGridSpec(
            num_scalar_prefetch=0,
            grid=(n_b, n_c),                                  # carried seq axis last
            in_specs=[
                pl.BlockSpec((Tc, L), lambda b, c: (c, b)),   # hidden slab (lane-dense)
                pl.BlockSpec((Tc, L), lambda b, c: (c, b)),   # gate slab (lane-dense)
                pl.BlockSpec((Tc, Tc), lambda b, c: (0, 0)),  # tril (resident)
            ],
            out_specs=pl.BlockSpec((Tc, L), lambda b, c: (c, b)),
            scratch_shapes=[
                pltpu.VMEM((1, L), jnp.float32),   # a_carry (running cumsum row)
                pltpu.VMEM((1, L), jnp.float32),   # m_carry (running column max)
                pltpu.VMEM((1, L), jnp.float32),   # s_carry (running rescaled sum-exp)
            ],
        ),
        compiler_params=pltpu.CompilerParams(
            # Batch tiles are independent -> sharded across the two v7x TensorCores;
            # codegen-neutral on single-TC v5e/v6e.  Seq-chunk axis carries state.
            dimension_semantics=("parallel", "arbitrary"),
        ),
        cost_estimate=pl.CostEstimate(
            flops=flops,
            transcendentals=transcendentals,
            bytes_accessed=bytes_accessed,
        ),
    )(hidden_f, gate_f, tril)

    # Unfold back to (B, T, D).
    return jnp.transpose(out_folded.reshape(T, B, D), (1, 0, 2))


def mingru_reference(x, w_hg):
    """Pure-JAX reference matching the PyTorch forward (seq_len > 1, no prev_hidden)."""
    hg = x @ w_hg
    D = x.shape[-1]
    hidden, gate = hg[..., :D], hg[..., D:]
    log_coeffs = -jax.nn.softplus(gate)
    log_z = -jax.nn.softplus(-gate)
    log_tilde_h = jnp.where(hidden >= 0.0,
                            jnp.log(jax.nn.relu(hidden) + 0.5),
                            -jax.nn.softplus(-hidden))
    log_values = log_z + log_tilde_h
    a_star = jnp.cumsum(log_coeffs, axis=1)
    v = log_values - a_star
    m = jnp.max(v, axis=1, keepdims=True)
    log_h0_plus_b_star = m + jnp.log(jnp.cumsum(jnp.exp(v - m), axis=1))
    return jnp.exp(a_star + log_h0_plus_b_star)


if __name__ == "__main__":
    B, T, D = 8, 16, 32  # batch, seq, dim  (expansion_factor=1.0 -> dim_inner = dim)

    key = jax.random.PRNGKey(0)
    kx, kw = jax.random.split(key)
    x = jax.random.normal(kx, (B, T, D), dtype=jnp.float32)
    # Linear(dim, 2*dim_inner, bias=False): weight (2D, D); we store its transpose.
    w_hg = (jax.random.normal(kw, (D, 2 * D), dtype=jnp.float32)
            * (1.0 / jnp.sqrt(D))).astype(jnp.float32)
    # to_out is Identity since expansion_factor == 1.0 (proj_out defaults to False).

    ref = mingru_reference(x, w_hg)

    # (a) one batch tile, one seq chunk: single grid step, widest lane slab.
    out_a = jax.block_until_ready(mingru_forward(x, w_hg))
    # (b) two seq chunks: exercises the carried (chunked) Heinsen scan.
    out_b = jax.block_until_ready(mingru_forward(x, w_hg, seq_chunk=8))
    # (c) two batch tiles x two seq chunks: exercises carry reset per batch tile.
    out_c = jax.block_until_ready(mingru_forward(x, w_hg, max_lanes=128, seq_chunk=8))

    for out in (out_a, out_b, out_c):
        assert out.shape == (B, T, D)
        assert jnp.allclose(out, ref, atol=3e-5, rtol=3e-5), "mismatch vs reference"

    print("KERNEL_OK")
</pallas_src>

<mosaic_0001>
module attributes {stable_mosaic.version = 11 : i64} {
  func.func @_mingru_scan_kernel(%arg0: i32, %arg1: i32, %arg2: memref<16x256xf32, #tpu.memory_space<vmem>>, %arg3: memref<16x256xf32, #tpu.memory_space<vmem>>, %arg4: memref<16x16xf32, #tpu.memory_space<vmem>>, %arg5: memref<16x256xf32, #tpu.memory_space<vmem>>, %arg6: memref<1x256xf32, #tpu.memory_space<vmem>>, %arg7: memref<1x256xf32, #tpu.memory_space<vmem>>, %arg8: memref<1x256xf32, #tpu.memory_space<vmem>>) attributes {dimension_semantics = [#tpu.dimension_semantics<parallel>, #tpu.dimension_semantics<arbitrary>], iteration_bounds = array<i64: 1, 1>, scalar_prefetch = 0 : i64, scratch_operands = 3 : i64, tpu.core_type = #tpu.core_type<tc>, window_params = [{transform_indices = @transform_0, window_bounds = array<i64: 16, 256>}, {transform_indices = @transform_1, window_bounds = array<i64: 16, 256>}, {pipeline_mode = #tpu.pipeline_mode<synchronous>, transform_indices = @transform_2, window_bounds = array<i64: 16, 16>}, {transform_indices = @transform_3, window_bounds = array<i64: 16, 256>}]} {
    %c0_i32 = arith.constant 0 : i32
    %0 = arith.cmpi eq, %arg1, %c0_i32 : i32
    %1 = arith.extui %0 : i1 to i32
    %c0_i32_0 = arith.constant 0 : i32
    %2 = arith.cmpi ne, %1, %c0_i32_0 : i32
    scf.if %2 {
      %cst_37 = arith.constant 0.000000e+00 : f32
      %74 = vector.broadcast %cst_37 : f32 to vector<1x256xf32>
      %c0_38 = arith.constant 0 : index
      %c0_39 = arith.constant 0 : index
      %75 = vector.load %arg6[%c0_38, %c0_39] : memref<1x256xf32, #tpu.memory_space<vmem>>, vector<1x256xf32>
      tpu.vector_store %arg6[%c0_38, %c0_39], %74 {strides = array<i32>} : memref<1x256xf32, #tpu.memory_space<vmem>>, vector<1x256xf32>,
      %cst_40 = arith.constant -1.000000e+30 : f32
      %76 = vector.broadcast %cst_40 : f32 to vector<1x256xf32>
      %c0_41 = arith.constant 0 : index
      %c0_42 = arith.constant 0 : index
      %77 = vector.load %arg7[%c0_41, %c0_42] : memref<1x256xf32, #tpu.memory_space<vmem>>, vector<1x256xf32>
      tpu.vector_store %arg7[%c0_41, %c0_42], %76 {strides = array<i32>} : memref<1x256xf32, #tpu.memory_space<vmem>>, vector<1x256xf32>,
      %cst_43 = arith.constant 0.000000e+00 : f32
      %78 = vector.broadcast %cst_43 : f32 to vector<1x256xf32>
      %c0_44 = arith.constant 0 : index
      %c0_45 = arith.constant 0 : index
      %79 = vector.load %arg8[%c0_44, %c0_45] : memref<1x256xf32, #tpu.memory_space<vmem>>, vector<1x256xf32>
      tpu.vector_store %arg8[%c0_44, %c0_45], %78 {strides = array<i32>} : memref<1x256xf32, #tpu.memory_space<vmem>>, vector<1x256xf32>,
    } else {
    }
    %c0 = arith.constant 0 : index
    %c0_1 = arith.constant 0 : index
    %3 = vector.load %arg2[%c0, %c0_1] : memref<16x256xf32, #tpu.memory_space<vmem>>, vector<16x256xf32>
    %c0_2 = arith.constant 0 : index
    %c0_3 = arith.constant 0 : index
    %4 = vector.load %arg3[%c0_2, %c0_3] : memref<16x256xf32, #tpu.memory_space<vmem>>, vector<16x256xf32>
    %c0_4 = arith.constant 0 : index
    %c0_5 = arith.constant 0 : index
    %5 = vector.load %arg4[%c0_4, %c0_5] : memref<16x16xf32, #tpu.memory_space<vmem>>, vector<16x16xf32>
    %6 = math.absf %4 : vector<16x256xf32>
    %cst = arith.constant 0.000000e+00 : f32
    %7 = vector.broadcast %cst : f32 to vector<16x256xf32>
    %8 = arith.subf %7, %6 : vector<16x256xf32>
    %9 = math.exp %8 : vector<16x256xf32>
    %10 = math.log1p %9 : vector<16x256xf32>
    %cst_6 = arith.constant 0.000000e+00 : f32
    %11 = vector.broadcast %cst_6 : f32 to vector<16x256xf32>
    %12 = arith.maximumf %4, %11 : vector<16x256xf32>
    %13 = arith.addf %12, %10 : vector<16x256xf32>
    %cst_7 = arith.constant 0.000000e+00 : f32
    %14 = vector.broadcast %cst_7 : f32 to vector<16x256xf32>
    %15 = arith.subf %14, %13 : vector<16x256xf32>
    %cst_8 = arith.constant 0.000000e+00 : f32
    %16 = vector.broadcast %cst_8 : f32 to vector<16x256xf32>
    %17 = arith.subf %16, %4 : vector<16x256xf32>
    %cst_9 = arith.constant 0.000000e+00 : f32
    %18 = vector.broadcast %cst_9 : f32 to vector<16x256xf32>
    %19 = arith.maximumf %17, %18 : vector<16x256xf32>
    %20 = arith.addf %19, %10 : vector<16x256xf32>
    %cst_10 = arith.constant 0.000000e+00 : f32
    %21 = vector.broadcast %cst_10 : f32 to vector<16x256xf32>
    %22 = arith.subf %21, %20 : vector<16x256xf32>
    %23 = math.absf %3 : vector<16x256xf32>
    %cst_11 = arith.constant 0.000000e+00 : f32
    %24 = vector.broadcast %cst_11 : f32 to vector<16x256xf32>
    %25 = arith.subf %24, %23 : vector<16x256xf32>
    %26 = math.exp %25 : vector<16x256xf32>
    %27 = math.log1p %26 : vector<16x256xf32>
    %cst_12 = arith.constant 0.000000e+00 : f32
    %28 = vector.broadcast %cst_12 : f32 to vector<16x256xf32>
    %29 = arith.cmpf oge, %3, %28 : vector<16x256xf32>
    %cst_13 = arith.constant 0.000000e+00 : f32
    %30 = vector.broadcast %cst_13 : f32 to vector<16x256xf32>
    %31 = arith.maximumf %3, %30 : vector<16x256xf32>
    %cst_14 = arith.constant 5.000000e-01 : f32
    %32 = vector.broadcast %cst_14 : f32 to vector<16x256xf32>
    %33 = arith.addf %31, %32 : vector<16x256xf32>
    %34 = math.log %33 : vector<16x256xf32>
    %cst_15 = arith.constant 0.000000e+00 : f32
    %35 = vector.broadcast %cst_15 : f32 to vector<16x256xf32>
    %36 = arith.subf %35, %3 : vector<16x256xf32>
    %cst_16 = arith.constant 0.000000e+00 : f32
    %37 = vector.broadcast %cst_16 : f32 to vector<16x256xf32>
    %38 = arith.maximumf %36, %37 : vector<16x256xf32>
    %39 = arith.addf %38, %27 : vector<16x256xf32>
    %cst_17 = arith.constant 0.000000e+00 : f32
    %40 = vector.broadcast %cst_17 : f32 to vector<16x256xf32>
    %41 = arith.subf %40, %39 : vector<16x256xf32>
    %42 = arith.select %29, %34, %41 : vector<16x256xi1>, vector<16x256xf32>
    %43 = arith.addf %22, %42 : vector<16x256xf32>
    %c0_18 = arith.constant 0 : index
    %c0_19 = arith.constant 0 : index
    %44 = vector.load %arg6[%c0_18, %c0_19] : memref<1x256xf32, #tpu.memory_space<vmem>>, vector<1x256xf32>
    %cst_20 = arith.constant dense<0.000000e+00> : vector<16x256xf32>
    %45 = tpu.matmul %5, %15, %cst_20 {dimension_numbers = #tpu.dot_dimension_numbers<[1], [0], [0], [1], [0, 0, 1, 1], [], []>} : vector<16x16xf32>, vector<16x256xf32>, vector<16x256xf32> -> vector<16x256xf32>
    %46 = vector.broadcast %44 : vector<1x256xf32> to vector<16x256xf32>
    %47 = arith.addf %46, %45 : vector<16x256xf32>
    %48 = arith.subf %43, %47 : vector<16x256xf32>
    %c0_21 = arith.constant 0 : index
    %c0_22 = arith.constant 0 : index
    %49 = vector.load %arg7[%c0_21, %c0_22] : memref<1x256xf32, #tpu.memory_space<vmem>>, vector<1x256xf32>
    %cst_23 = arith.constant dense<0xFF800000> : vector<256xf32>
    %50 = vector.multi_reduction <maximumf>, %48, %cst_23 [0] : vector<16x256xf32> to vector<256xf32>
    %51 = vector.shape_cast %50 : vector<256xf32> to vector<1x256xf32>
    %52 = arith.maximumf %49, %51 : vector<1x256xf32>
    %53 = vector.broadcast %52 : vector<1x256xf32> to vector<16x256xf32>
    %54 = arith.subf %48, %53 : vector<16x256xf32>
    %55 = math.exp %54 : vector<16x256xf32>
    %c0_24 = arith.constant 0 : index
    %c0_25 = arith.constant 0 : index
    %56 = vector.load %arg8[%c0_24, %c0_25] : memref<1x256xf32, #tpu.memory_space<vmem>>, vector<1x256xf32>
    %c0_26 = arith.constant 0 : index
    %c0_27 = arith.constant 0 : index
    %57 = vector.load %arg7[%c0_26, %c0_27] : memref<1x256xf32, #tpu.memory_space<vmem>>, vector<1x256xf32>
    %58 = arith.subf %57, %52 : vector<1x256xf32>
    %59 = math.exp %58 : vector<1x256xf32>
    %60 = arith.mulf %56, %59 : vector<1x256xf32>
    %cst_28 = arith.constant dense<0.000000e+00> : vector<16x256xf32>
    %61 = tpu.matmul %5, %55, %cst_28 {dimension_numbers = #tpu.dot_dimension_numbers<[1], [0], [0], [1], [0, 0, 1, 1], [], []>} : vector<16x16xf32>, vector<16x256xf32>, vector<16x256xf32> -> vector<16x256xf32>
    %62 = vector.broadcast %60 : vector<1x256xf32> to vector<16x256xf32>
    %63 = arith.addf %62, %61 : vector<16x256xf32>
    %64 = vector.broadcast %52 : vector<1x256xf32> to vector<16x256xf32>
    %65 = arith.addf %47, %64 : vector<16x256xf32>
    %66 = math.exp %65 : vector<16x256xf32>
    %67 = arith.mulf %66, %63 : vector<16x256xf32>
    %c0_29 = arith.constant 0 : index
    %c0_30 = arith.constant 0 : index
    %68 = vector.load %arg5[%c0_29, %c0_30] : memref<16x256xf32, #tpu.memory_space<vmem>>, vector<16x256xf32>
    tpu.vector_store %arg5[%c0_29, %c0_30], %67 {strides = array<i32>} : memref<16x256xf32, #tpu.memory_space<vmem>>, vector<16x256xf32>,
    %69 = vector.extract_strided_slice %47 {offsets = [15, 0], sizes = [1, 256], strides = [1, 1]} : vector<16x256xf32> to vector<1x256xf32>
    %c0_31 = arith.constant 0 : index
    %c0_32 = arith.constant 0 : index
    %70 = vector.load %arg6[%c0_31, %c0_32] : memref<1x256xf32, #tpu.memory_space<vmem>>, vector<1x256xf32>
    tpu.vector_store %arg6[%c0_31, %c0_32], %69 {strides = array<i32>} : memref<1x256xf32, #tpu.memory_space<vmem>>, vector<1x256xf32>,
    %c0_33 = arith.constant 0 : index
    %c0_34 = arith.constant 0 : index
    %71 = vector.load %arg7[%c0_33, %c0_34] : memref<1x256xf32, #tpu.memory_space<vmem>>, vector<1x256xf32>
    tpu.vector_store %arg7[%c0_33, %c0_34], %52 {strides = array<i32>} : memref<1x256xf32, #tpu.memory_space<vmem>>, vector<1x256xf32>,
    %72 = vector.extract_strided_slice %63 {offsets = [15, 0], sizes = [1, 256], strides = [1, 1]} : vector<16x256xf32> to vector<1x256xf32>
    %c0_35 = arith.constant 0 : index
    %c0_36 = arith.constant 0 : index
    %73 = vector.load %arg8[%c0_35, %c0_36] : memref<1x256xf32, #tpu.memory_space<vmem>>, vector<1x256xf32>
    tpu.vector_store %arg8[%c0_35, %c0_36], %72 {strides = array<i32>} : memref<1x256xf32, #tpu.memory_space<vmem>>, vector<1x256xf32>,
    return
  }
  func.func @transform_0(%arg0: i32, %arg1: i32) -> (i32, i32) {
    %c0_i32 = arith.constant 0 : i32
    return %arg1, %arg0 : i32, i32
  }
  func.func @transform_1(%arg0: i32, %arg1: i32) -> (i32, i32) {
    %c0_i32 = arith.constant 0 : i32
    return %arg1, %arg0 : i32, i32
  }
  func.func @transform_2(%arg0: i32, %arg1: i32) -> (i32, i32) {
    %c0_i32 = arith.constant 0 : i32
    %c0_i32_0 = arith.constant 0 : i32
    %c0_i32_1 = arith.constant 0 : i32
    return %c0_i32, %c0_i32_0 : i32, i32
  }
  func.func @transform_3(%arg0: i32, %arg1: i32) -> (i32, i32) {
    %c0_i32 = arith.constant 0 : i32
    return %arg1, %arg0 : i32, i32
  }
}

</mosaic_0001>

<bundles_post_ra>
// kernel: tpu_custom_call.1
= control target key start
LH: loop header
LB: loop body
LE: loop exit
PB: predicated region body
PF: predicated region fallthrough
CT: control target
= control target key end

     0   :  { %8 = vsyncpa [#allocation6], 0  ;;  %s1000_s0 = inlined_call_operand.hbm [shape: f32[16,256], index: 0, kind: input, shape index: {}]   ;;  %s1001_s1 = inlined_call_operand.hbm [shape: f32[16,256], index: 1, kind: input, shape index: {}]   ;;  %s1002_s2 = inlined_call_operand.hbm [shape: f32[16,16], index: 2, kind: input, shape index: {}]   ;;  %s1003_s3 = inlined_call_operand.hbm [shape: f32[16,256], index: 3, kind: output, shape index: {}]  }
   0x1   :  { %9 = vsyncpa [#allocation9], 0 }
   0x2   :  { %10 = vsyncpa [#allocation7], 0  ;;  %s771_s12 = smov [#allocation8]   ;;  %s772_s14 = smov [#allocation5]  }
   0x3   :  { %s28_s13 = sshll.u32 %s771_s12, 4  ;;  %s16_s15 = sshll.u32 %s772_s14, 4  ;;  %s29_s13 = int_to_ptr.vmem [resolvable:$true] %s28_s13  ;;  %s802_s15 = int_to_ptr.vmem [resolvable:$true] %s16_s15 }
   0x4   :  { %s677_s18 = scalar_lea.hbm %s1001_s1, 512 }
   0x5   :  { %p678_p0 = scmp.ne.s32.totalorder %s1001_s1, %s677_s18  ;;  %p681_p1 = scmp.lt.u32.totalorder %s677_s18, %s1001_s1 }
   0x7   :  { %p683_p2 = pnand %p681_p1, %p678_p0 }
   0x9   :  { %686 = shalt.err (!%p683_p2)
}
   0xa   :  { %s687_s23 = scalar_lea.vmem %s29_s13, 512  ;;  %p692_p4 = scmp.lt.s32.totalorder %s29_s13, %s29_s13 }
   0xb   :  { %p688_p3 = scmp.ne.s32.totalorder %s29_s13, %s687_s23  ;;  %p693_p5 = scmp.lt.s32.totalorder %s687_s23, %s687_s23 }
   0xd   :  { %p694_p6 = por %p693_p5, %p692_p4 }
   0xf   :  { %p695_p7 = pnand %p694_p6, %p688_p3 }
  0x11   :  { %698 = shalt.err (!%p695_p7)
}
  0x12   :  { %s773_s24 = smov 256   ;;  %s774_s25 = smov 16  }
  0x13   :  { %34 = dma.hbm_to_vmem [thread:$0]  %s1001_s1, 512, %s29_s13, [#allocation9], %s773_s24, %s773_s24, %s774_s25  }
  0x14   :  { %s699_s30 = scalar_lea.hbm %s1000_s0, 512 }
  0x15   :  { %p700_p8 = scmp.ne.s32.totalorder %s1000_s0, %s699_s30  ;;  %p703_p9 = scmp.lt.u32.totalorder %s699_s30, %s1000_s0 }
  0x17   :  { %p705_p10 = pnand %p703_p9, %p700_p8 }
  0x19   :  { %708 = shalt.err (!%p705_p10)
}
  0x1a   :  { %s709_s8 = scalar_lea.vmem %s802_s15, 512  ;;  %p714_p12 = scmp.lt.s32.totalorder %s802_s15, %s802_s15 }
  0x1b   :  { %p710_p11 = scmp.ne.s32.totalorder %s802_s15, %s709_s8  ;;  %p715_p13 = scmp.lt.s32.totalorder %s709_s8, %s709_s8 }
  0x1d   :  { %p716_p0 = por %p715_p13, %p714_p12 }
  0x1f   :  { %p717_p1 = pnand %p716_p0, %p710_p11 }
  0x21   :  { %720 = shalt.err (!%p717_p1)
}
  0x22   :  { %22 = dma.hbm_to_vmem [thread:$0]  %s1000_s0, 512, %s802_s15, [#allocation6], %s773_s24, %s773_s24, %s774_s25  }
  0x23   :  { %s775_s10 = smov [#allocation10]   ;;  %s721_s14 = scalar_lea.hbm %s1002_s2, 256 }
  0x24   :  { %s40_s11 = sshll.u32 %s775_s10, 4  ;;  %p722_p2 = scmp.ne.s32.totalorder %s1002_s2, %s721_s14  ;;  %s41_s11 = int_to_ptr.vmem [resolvable:$true] %s40_s11 }
  0x25   :  { %p725_p3 = scmp.lt.u32.totalorder %s721_s14, %s1002_s2 }
  0x27   :  { %p727_p4 = pnand %p725_p3, %p722_p2 }
  0x29   :  { %730 = shalt.err (!%p727_p4)
}
  0x2a   :  { %s731_s20 = scalar_lea.vmem %s41_s11, 256  ;;  %p736_p6 = scmp.lt.s32.totalorder %s41_s11, %s41_s11 }
  0x2b   :  { %p732_p5 = scmp.ne.s32.totalorder %s41_s11, %s731_s20  ;;  %p737_p7 = scmp.lt.s32.totalorder %s731_s20, %s731_s20 }
  0x2d   :  { %p738_p8 = por %p737_p7, %p736_p6 }
  0x2f   :  { %p739_p9 = pnand %p738_p8, %p732_p5 }
  0x31   :  { %742 = shalt.err (!%p739_p9)
}
  0x32   :  { %s776_s0 = smov 128   ;;  %s777_s15 = smov 8  }
  0x33   :  { %46 = dma.hbm_to_vmem [thread:$0]  %s1002_s2, 256, %s41_s11, [#allocation9], %s776_s0, %s776_s0, %s777_s15  }
  0x34   :  { %765 = dma.done.wait [#allocation6], 512  }
  0x35   :  { %766 = vsyncadd [#allocation6], 4294966784 }
  0x36   :  { %767 = dma.done.wait [#allocation9], 768  }
  0x37   :  { %768 = vsyncadd [#allocation9], 4294966528  ;;  %v60_v0 = vlaneseq  ;;  %v778_v1 = vmov 0.0   ;;  %v779_v3 = vmov -1e+30   ;;  %v866_v4 = vld [vmem:[#allocation8 + $0x8] sm:$0xff] }
  0x38   :  { %325 = vmatprep.mubr.f32.mxu0 %v778_v1  ;;  %483 = vmatprep.mubr.f32.mxu1 %v778_v1  ;;  %v868_v5 = vld [vmem:[#allocation8 + $0x18] sm:$0xff]  ;;  %v870_v6 = vld [vmem:[#allocation8] sm:$0xff]  ;;  %v78_v7 = vand.u32 2147483647, %v866_v4  ;;  %v874_v9 = vld [vmem:[#allocation8 + $0x10] sm:$0xff]  ;;  %v142_v35 = vsub.f32 0.0, %v866_v4 }
  0x39   :  { %vm854_vm0 = vcmp.lt.s32.totalorder %v60_v0, 256  ;;  %v80_v8 = vand.u32 2147483647, %v868_v5  ;;  %v77_v10 = vand.u32 2147483647, %v870_v6  ;;  %v144_v37 = vsub.f32 0.0, %v868_v5 }
  0x3a   :  { %64 = vst.msk [vmem:[#allocation2] sm:$0x3] %vm854_vm0, %v778_v1  ;;  %65 = vst.msk [vmem:[#allocation3] sm:$0x3] %vm854_vm0, %v779_v3  ;;  %v82_v11 = vsub.f32 0.0, %v78_v7  ;;  %v130_v39 = vmax.f32 %v866_v4, 0.0 }
  0x3b   :  { %66 = vst.msk [vmem:[#allocation4] sm:$0x3] %vm854_vm0, %v778_v1  ;;  %v84_v12 = vsub.f32 0.0, %v80_v8  ;;  %v79_v13 = vand.u32 2147483647, %v874_v9  ;;  %v81_v14 = vsub.f32 0.0, %v77_v10 }
  0x3c   :  { %v87_v15 = vmul.f32 1.442695, %v82_v11  ;;  %v132_v40 = vmax.f32 %v868_v5, 0.0  ;;  %v141_v42 = vsub.f32 0.0, %v870_v6  ;;  %v129_v45 = vmax.f32 %v870_v6, 0.0  ;;  %s781_s2 = smov [#allocation11]  }
  0x3d   :  { %v91_v16 = vmul.f32 1.442695, %v84_v12  ;;  %v83_v17 = vsub.f32 0.0, %v79_v13  ;;  %v85_v18 = vmul.f32 1.442695, %v81_v14  ;;  %v143_v46 = vsub.f32 0.0, %v874_v9 }
  0x3e   :  { %619 = vpow2.f32 %v87_v15  ;;  %v146_v49 = vmax.f32 %v142_v35, 0.0  ;;  %v148_v53 = vmax.f32 %v144_v37, 0.0  ;;  %v131_v57 = vmax.f32 %v874_v9, 0.0  ;;  %s583_s23 = sshll.u32 %s781_s2, 4  ;;  %s584_s23 = int_to_ptr.vmem [resolvable:$true] %s583_s23 }
  0x3f   :  { %v89_v19 = vmul.f32 1.442695, %v83_v17  ;;  %621 = vpow2.f32 %v91_v16  ;;  %v145_v58 = vmax.f32 %v141_v42, 0.0  ;;  %v147_v62 = vmax.f32 %v143_v46, 0.0  ;;  %s743_s26 = scalar_lea.vmem %s584_s23, 512  ;;  %p748_p11 = scmp.lt.s32.totalorder %s584_s23, %s584_s23 }
  0x40   :  { %623 = vpow2.f32 %v85_v18  ;;  %vm254_vm5 = vcmask 130048   ;;  %p744_p10 = scmp.ne.s32.totalorder %s584_s23, %s743_s26  ;;  %p749_p12 = scmp.lt.s32.totalorder %s743_s26, %s743_s26 }
  0x41   :  { %625 = vpow2.f32 %v89_v19 }
  0x42   :  { %p750_p13 = por %p749_p12, %p748_p11 }
  0x44   :  { %p751_p0 = pnand %p750_p13, %p744_p10 }
  0x48   :  { %v620_v20 = vpop.eup %619 }
  0x49   :  { %v622_v21 = vpop.eup %621  ;;  %v102_v22 = vadd.f32 1.0, %v620_v20  ;;  %v105_v27 = vmul.f32 -0.5, %v620_v20  ;;  %v108_v33 = vand.u32 2147483647, %v620_v20 }
  0x4a   :  { %v624_v23 = vpop.eup %623  ;;  %v120_v24 = vadd.f32 1.0, %v622_v21  ;;  %v123_v28 = vmul.f32 -0.5, %v622_v21  ;;  %v126_v36 = vand.u32 2147483647, %v622_v21 }
  0x4b   :  { %v626_v25 = vpop.eup %625  ;;  %627 = vlog2.f32 %v102_v22  ;;  %v93_v26 = vadd.f32 1.0, %v624_v23  ;;  %v96_v30 = vmul.f32 -0.5, %v624_v23  ;;  %v106_v31 = vadd.f32 1.0, %v105_v27  ;;  %v899_v22 = vld [vmem:[#allocation10 + $0x8] sm:$0xff]  ;;  %v909_v27 = vld [vmem:[#allocation5 + $0x10] sm:$0xff] }
  0x4c   :  { %629 = vlog2.f32 %v120_v24  ;;  %v111_v29 = vadd.f32 1.0, %v626_v25  ;;  %v114_v32 = vmul.f32 -0.5, %v626_v25  ;;  %v124_v34 = vadd.f32 1.0, %v123_v28  ;;  %v905_v24 = vld [vmem:[#allocation5 + $0x8] sm:$0xff]  ;;  %v911_v28 = vld [vmem:[#allocation5 + $0x18] sm:$0xff] }
  0x4d   :  { %631 = vlog2.f32 %v93_v26  ;;  %v97_v38 = vadd.f32 1.0, %v96_v30  ;;  %v99_v41 = vand.u32 2147483647, %v624_v23  ;;  %v107_v43 = vmul.f32 %v620_v20, %v106_v31 }
  0x4e   :  { %633 = vlog2.f32 %v111_v29  ;;  %v115_v44 = vadd.f32 1.0, %v114_v32  ;;  %vm109_vm1 = vcmp.lt.f32.partialorder %v108_v33, 0.0004427343  ;;  %v125_v48 = vmul.f32 %v622_v21, %v124_v34  ;;  %v894_v21 = vld [vmem:[#allocation10] sm:$0xff] }
  0x4f   :  { %v117_v50 = vand.u32 2147483647, %v626_v25  ;;  %vm127_vm2 = vcmp.lt.f32.partialorder %v126_v36, 0.0004427343  ;;  %v98_v54 = vmul.f32 %v624_v23, %v97_v38  ;;  %vm100_vm3 = vcmp.lt.f32.partialorder %v99_v41, 0.0004427343 }
  0x50   :  { %v116_v61 = vmul.f32 %v626_v25, %v115_v44  ;;  %v903_v23 = vld [vmem:[#allocation5] sm:$0xff]  ;;  %v158_v26 = vand.u32 2147483647, %v905_v24  ;;  %v159_v30 = vand.u32 2147483647, %v909_v27  ;;  %vm210_vm11 = vcmp.ge.f32.partialorder %v905_v24, 0.0 }
  0x51   :  { %vm118_vm4 = vcmp.lt.f32.partialorder %v117_v50, 0.0004427343  ;;  %v157_v25 = vand.u32 2147483647, %v903_v23  ;;  %v160_v32 = vand.u32 2147483647, %v911_v28 }
  0x52   :  { %v162_v31 = vsub.f32 0.0, %v158_v26  ;;  %v163_v34 = vsub.f32 0.0, %v159_v30  ;;  %v231_v30 = vsub.f32 0.0, %v909_v27  ;;  %vm209_vm10 = vcmp.ge.f32.partialorder %v903_v23, 0.0 }
  0x53   :  { %v161_v29 = vsub.f32 0.0, %v157_v25  ;;  %v164_v36 = vsub.f32 0.0, %v160_v32  ;;  %vm211_vm12 = vcmp.ge.f32.partialorder %v909_v27, 0.0  ;;  %vm212_vm13 = vcmp.ge.f32.partialorder %v911_v28, 0.0 }
  0x54   :  { %v167_v35 = vmul.f32 1.442695, %v162_v31  ;;  %v169_v37 = vmul.f32 1.442695, %v163_v34  ;;  %v232_v34 = vsub.f32 0.0, %v911_v28 }
  0x55   :  { %v628_v47 = vpop.eup %627  ;;  %v165_v33 = vmul.f32 1.442695, %v161_v29  ;;  %v171_v38 = vmul.f32 1.442695, %v164_v36 }
  0x56   :  { %v630_v51 = vpop.eup %629  ;;  %v104_v52 = vmul.f32 0.6931472, %v628_v47  ;;  %v213_v47 = vmax.f32 %v903_v23, 0.0 }
  0x57   :  { %v632_v55 = vpop.eup %631  ;;  %v122_v56 = vmul.f32 0.6931472, %v630_v51  ;;  %635 = vpow2.f32 %v165_v33 }
  0x58   :  { %v110_v59 = vsel %vm109_vm1, %v107_v43, %v104_v52  ;;  %v95_v60 = vmul.f32 0.6931472, %v632_v55  ;;  %v634_v63 = vpop.eup %633  ;;  %637 = vpow2.f32 %v167_v35  ;;  %v217_v51 = vadd.f32 0.5, %v213_v47 }
  0x59   :  { %v128_v3 = vsel %vm127_vm2, %v125_v48, %v122_v56  ;;  %v134_v4 = vadd.f32 %v130_v39, %v110_v59  ;;  %v886_v5 = vadd.f32 %v146_v49, %v110_v59  ;;  %v113_v10 = vmul.f32 0.6931472, %v634_v63 }
  0x5a   :  { %v136_v6 = vadd.f32 %v132_v40, %v128_v3  ;;  %v888_v7 = vadd.f32 %v148_v53, %v128_v3  ;;  %v101_v8 = vsel %vm100_vm3, %v98_v54, %v95_v60  ;;  %639 = vpow2.f32 %v169_v37 }
  0x5b   :  { %v138_v11 = vsub.f32 0.0, %v134_v4  ;;  %v133_v12 = vadd.f32 %v129_v45, %v101_v8  ;;  %v890_v13 = vadd.f32 %v145_v58, %v101_v8  ;;  %v119_v14 = vsel %vm118_vm4, %v116_v61, %v113_v10 }
  0x5c   :  { %v140_v9 = vsub.f32 0.0, %v136_v6  ;;  %v135_v15 = vadd.f32 %v131_v57, %v119_v14  ;;  %v892_v17 = vadd.f32 %v147_v62, %v119_v14  ;;  %641 = vpow2.f32 %v171_v38 }
  0x5d   :  { %v137_v16 = vsub.f32 0.0, %v133_v12  ;;  %v214_v49 = vmax.f32 %v905_v24, 0.0  ;;  %v215_v52 = vmax.f32 %v909_v27, 0.0  ;;  %v216_v55 = vmax.f32 %v911_v28, 0.0 }
  0x5e   :  { %v600_v18 = vpack.c.bf16 %v140_v9, %v138_v11  ;;  %v139_v19 = vsub.f32 0.0, %v135_v15  ;;  %v229_v62 = vsub.f32 0.0, %v903_v23  ;;  %v230_v11 = vsub.f32 0.0, %v905_v24 }
  0x5f   :  { %v218_v54 = vadd.f32 0.5, %v214_v49  ;;  %v219_v3 = vadd.f32 0.5, %v215_v52  ;;  %v220_v8 = vadd.f32 0.5, %v216_v55  ;;  %v236_v47 = vmax.f32 %v232_v34, 0.0 }
  0x60   :  { %601 = vmatprep.subr.bf16.mxu0 %v600_v18  ;;  %v602_v20 = vpack.c.bf16 %v139_v19, %v137_v16  ;;  %v233_v29 = vmax.f32 %v229_v62, 0.0  ;;  %v234_v31 = vmax.f32 %v230_v11, 0.0 }
  0x61   :  { %v636_v39 = vpop.eup %635 }
  0x62   :  { %603 = vmatpush1.bf16.msra.mxu0 %v602_v20  ;;  %v638_v40 = vpop.eup %637  ;;  %v173_v41 = vadd.f32 1.0, %v636_v39  ;;  %v176_v48 = vmul.f32 -0.5, %v636_v39  ;;  %v179_v57 = vand.u32 2147483647, %v636_v39 }
  0x63   :  { %v182_v43 = vadd.f32 1.0, %v638_v40  ;;  %v185_v50 = vmul.f32 -0.5, %v638_v40  ;;  %v188_v63 = vand.u32 2147483647, %v638_v40 }
  0x64   :  { %v640_v42 = vpop.eup %639  ;;  %643 = vlog2.f32 %v173_v41  ;;  %v177_v53 = vadd.f32 1.0, %v176_v48  ;;  %vm920_vm6 = vcmp.lt.f32.partialorder %v179_v57, 0.0004427343  ;;  %v340_v41 = vshrl.u32 %v60_v0, 7  ;;  %v253_v0 = vld [vmem:[#allocation2] sm:$0x3] }
  0x65   :  { %596 = vmatmul.mubr.msk.f32.vlgmr.msra.gmra.mrb[0].mxu0 %vm254_vm5, %v894_v21  ;;  %v191_v45 = vadd.f32 1.0, %v640_v42  ;;  %645 = vlog2.f32 %v182_v43  ;;  %v194_v58 = vmul.f32 -0.5, %v640_v42  ;;  %v186_v59 = vadd.f32 1.0, %v185_v50 }
  0x66   :  { %331 = vmatprep.mubr.f32.mxu0 %v778_v1  ;;  %v642_v44 = vpop.eup %641  ;;  %v178_v6 = vmul.f32 %v636_v39, %v177_v53  ;;  %v197_v16 = vand.u32 2147483647, %v640_v42  ;;  %vm925_vm7 = vcmp.lt.f32.partialorder %v188_v63, 0.0004427343  ;;  %v235_v43 = vmax.f32 %v231_v30, 0.0 }
  0x67   :  { %v200_v46 = vadd.f32 1.0, %v642_v44  ;;  %647 = vlog2.f32 %v191_v45  ;;  %v203_v60 = vmul.f32 -0.5, %v642_v44  ;;  %v195_v12 = vadd.f32 1.0, %v194_v58 }
  0x68   :  { %v187_v15 = vmul.f32 %v638_v40, %v186_v59  ;;  %v206_v25 = vand.u32 2147483647, %v642_v44  ;;  %vm935_vm8 = vcmp.lt.f32.partialorder %v197_v16, 0.0004427343  ;;  %v952_v58 = vsub.s32 1, %v340_v41 }
  0x69   :  { %597 = vmatmul.mubr.msk.f32.gmra.mrb[2].mxu0 %vm254_vm5, %v899_v22  ;;  %649 = vlog2.f32 %v200_v46  ;;  %v204_v18 = vadd.f32 1.0, %v203_v60  ;;  %v196_v33 = vmul.f32 %v640_v42, %v195_v12  ;;  %v154_v59 = vsub.f32 0.0, %v886_v5 }
  0x6a   :  { %651 = vlog2.f32 %v217_v51  ;;  %vm939_vm9 = vcmp.lt.f32.partialorder %v206_v25, 0.0004427343  ;;  %v948_v51 = vsub.s32 0, %v340_v41  ;;  %v153_v60 = vsub.f32 0.0, %v890_v13 }
  0x6b   :  { %653 = vlog2.f32 %v218_v54  ;;  %v205_v38 = vmul.f32 %v642_v44, %v204_v18  ;;  %v346_v24 = vrot.slane %v253_v0, %v952_v58  ;;  %v155_v5 = vsub.f32 0.0, %v892_v17 }
  0x6c   :  { %655 = vlog2.f32 %v219_v3  ;;  %v342_v62 = vrot.slane %v253_v0, %v948_v51  ;;  %v156_v13 = vsub.f32 0.0, %v888_v7 }
  0x6d   :  { %657 = vlog2.f32 %v220_v8  ;;  %v780_v8 = vmov 1966171168  }
  0x6e   :  { %v644_v56 = vpop.eup %643  ;;  %v376_v10 = vunpack.c.l.s4 %v780_v8 }
  0x6f   :  { %v646_v61 = vpop.eup %645  ;;  %v175_v4 = vmul.f32 0.6931472, %v644_v56 }
  0x70   :  { %v184_v14 = vmul.f32 0.6931472, %v646_v61  ;;  %v377_v27 = vunpack.c.0.s8 %v376_v10 }
  0x71   :  { %v648_v9 = vpop.eup %647  ;;  %v181_v26 = vsel %vm920_vm6, %v178_v6, %v175_v4 }
  0x72   :  { %v193_v32 = vmul.f32 0.6931472, %v648_v9  ;;  %v190_v35 = vsel %vm925_vm7, %v187_v15, %v184_v14  ;;  %v237_v40 = vadd.f32 %v233_v29, %v181_v26 }
  0x73   :  { %v650_v19 = vpop.eup %649  ;;  %v238_v45 = vadd.f32 %v234_v31, %v190_v35 }
  0x74   :  { %v202_v37 = vmul.f32 0.6931472, %v650_v19  ;;  %v652_v42 = vpop.eup %651  ;;  %v199_v46 = vsel %vm935_vm8, %v196_v33, %v193_v32  ;;  %v241_v44 = vsub.f32 0.0, %v237_v40  ;;  %v962_v32 = vsub.s32 %v377_v27, %v340_v41 }
  0x75   :  { %v654_v48 = vpop.eup %653  ;;  %v222_v50 = vmul.f32 0.6931472, %v652_v42  ;;  %v239_v52 = vadd.f32 %v235_v43, %v199_v46  ;;  %v242_v55 = vsub.f32 0.0, %v238_v45 }
  0x76   :  { %v208_v49 = vsel %vm939_vm9, %v205_v38, %v202_v37  ;;  %v656_v53 = vpop.eup %655  ;;  %v224_v54 = vmul.f32 0.6931472, %v654_v48 }
  0x77   :  { %v240_v56 = vadd.f32 %v236_v47, %v208_v49  ;;  %v658_v57 = vpop.eup %657  ;;  %v245_v61 = vsel %vm209_vm10, %v222_v50, %v241_v44  ;;  %v226_v63 = vmul.f32 0.6931472, %v656_v53  ;;  %v243_v3 = vsub.f32 0.0, %v239_v52 }
  0x78   :  { %v246_v4 = vsel %vm210_vm11, %v224_v54, %v242_v55  ;;  %v228_v23 = vmul.f32 0.6931472, %v658_v57  ;;  %v249_v11 = vadd.f32 %v245_v61, %v153_v60  ;;  %v357_v55 = vld [vmem:[#allocation3] sm:$0x3] }
  0x79   :  { %v244_v6 = vsub.f32 0.0, %v240_v56  ;;  %v250_v9 = vadd.f32 %v246_v4, %v154_v59  ;;  %v247_v14 = vsel %vm211_vm12, %v226_v63, %v243_v3 }
  0x7a   :  { %v251_v25 = vadd.f32 %v247_v14, %v155_v5 }
  0x7b   :  { %v248_v18 = vsel %vm212_vm13, %v228_v23, %v244_v6 }
  0x7c   :  { %v252_v30 = vadd.f32 %v248_v18, %v156_v13 }
 0x138   :  { %v327_v12 = vpop.f32.mrb[0].mxu0 }
 0x139   :  { %v349_v15 = vadd.f32 %v342_v62, %v327_v12  ;;  %v329_v16 = vpop.f32.mrb[1].mxu0 }
 0x13a   :  { %v350_v19 = vadd.f32 %v346_v24, %v329_v16 }
 0x13b   :  { %v353_v20 = vsub.f32 %v249_v11, %v349_v15 }
 0x13c   :  { %v354_v26 = vsub.f32 %v250_v9, %v350_v19  ;;  %v333_v29 = vpop.f32.mrb[2].mxu0 }
 0x13d   :  { %v351_v31 = vadd.f32 %v342_v62, %v333_v29  ;;  %v335_v28 = vpop.f32.mrb[3].mxu0 }
 0x13e   :  { %v352_v17 = vadd.f32 %v346_v24, %v335_v28 }
 0x13f   :  { %v355_v33 = vsub.f32 %v251_v25, %v351_v31 }
 0x140   :  { %v356_v7 = vsub.f32 %v252_v30, %v352_v17  ;;  %v533_v34 = vcombine.high %v351_v31, %v352_v17 }
 0x141   :  { %v358_v35 = vmax.f32 %v353_v20, %v355_v33 }
 0x142   :  { %v365_v36 = vmax.f32 %v354_v26, %v356_v7  ;;  %v540_v37 = vrot.slane %v533_v34, %v962_v32 }
 0x143   :  { %v359_v38 = vrot.slane %v358_v35, 4 }
 0x144   :  { %v366_v39 = vrot.slane %v365_v36, 4  ;;  %v541_v40 = vcombine.high %v540_v37, %v540_v37 }
 0x145   :  { %v360_v43 = vmax.f32 %v358_v35, %v359_v38 }
 0x146   :  { %v367_v42 = vmax.f32 %v365_v36, %v366_v39  ;;  %v548_v45 = vrot.slane %v541_v40, %v962_v32 }
 0x147   :  { %v361_v46 = vrot.slane %v360_v43, 2 }
 0x148   :  { %v368_v47 = vrot.slane %v367_v42, 2  ;;  %v549_v48 = vcombine.high %v548_v45, %v548_v45 }
 0x149   :  { %v362_v41 = vmax.f32 %v360_v43, %v361_v46 }
 0x14a   :  { %v369_v49 = vmax.f32 %v367_v42, %v368_v47  ;;  %555 = vst.msk [vmem:[#allocation2] sm:$0x3] %vm854_vm0, %v549_v48 }
 0x14b   :  { %v363_v50 = vrot.slane %v362_v41, 1 }
 0x14c   :  { %v370_v44 = vrot.slane %v369_v49, 1 }
 0x14d   :  { %v364_v52 = vmax.f32 %v362_v41, %v363_v50 }
 0x14e   :  { %v371_v53 = vmax.f32 %v369_v49, %v370_v44 }
 0x150   :  { %v374_v0 = vcombine.low %v364_v52, %v371_v53 }
 0x152   :  { %v381_v54 = vrot.slane %v374_v0, %v962_v32 }
 0x154   :  { %v388_v56 = vrot.slane %v381_v54, %v962_v32 }
 0x156   :  { %v390_v57 = vmax.f32 %v357_v55, %v388_v56 }
 0x158   :  { %v399_v59 = vrot.slane %v390_v57, %v952_v58  ;;  %556 = vst.msk [vmem:[#allocation3] sm:$0x3] %vm854_vm0, %v390_v57  ;;  %v395_v60 = vrot.slane %v390_v57, %v948_v51  ;;  %v415_v61 = vsub.f32 %v357_v55, %v390_v57 }
 0x15a   :  { %v405_v62 = vsub.f32 %v356_v7, %v399_v59  ;;  %v514_v63 = vadd.f32 %v399_v59, %v352_v17  ;;  %v403_v3 = vsub.f32 %v354_v26, %v399_v59  ;;  %v402_v4 = vsub.f32 %v353_v20, %v395_v60  ;;  %v414_v26 = vld [vmem:[#allocation4] sm:$0x3] }
 0x15b   :  { %v404_v23 = vsub.f32 %v355_v33, %v395_v60  ;;  %v511_v6 = vadd.f32 %v395_v60, %v349_v15  ;;  %v512_v8 = vadd.f32 %v399_v59, %v350_v19  ;;  %v513_v5 = vadd.f32 %v395_v60, %v351_v31 }
 0x15c   :  { %v412_v10 = vmul.f32 1.442695, %v405_v62  ;;  %v408_v24 = vmul.f32 1.442695, %v403_v3  ;;  %v406_v11 = vmul.f32 1.442695, %v402_v4 }
 0x15d   :  { %v410_v13 = vmul.f32 1.442695, %v404_v23  ;;  %v416_v15 = vmul.f32 1.442695, %v415_v61  ;;  %v515_v19 = vmul.f32 1.442695, %v511_v6 }
 0x15e   :  { %659 = vpow2.f32 %v412_v10  ;;  %v517_v20 = vmul.f32 1.442695, %v512_v8  ;;  %v519_v29 = vmul.f32 1.442695, %v513_v5  ;;  %v521_v30 = vmul.f32 1.442695, %v514_v63 }
 0x15f   :  { %661 = vpow2.f32 %v408_v24 }
 0x160   :  { %663 = vpow2.f32 %v406_v11 }
 0x161   :  { %665 = vpow2.f32 %v410_v13 }
 0x162   :  { %667 = vpow2.f32 %v416_v15 }
 0x163   :  { %669 = vpow2.f32 %v515_v19 }
 0x164   :  { %671 = vpow2.f32 %v517_v20 }
 0x165   :  { %673 = vpow2.f32 %v519_v29 }
 0x166   :  { %675 = vpow2.f32 %v521_v30 }
 0x168   :  { %v660_v12 = vpop.eup %659 }
 0x169   :  { %v662_v9 = vpop.eup %661 }
 0x16a   :  { %v664_v14 = vpop.eup %663  ;;  %v604_v16 = vpack.c.bf16 %v660_v12, %v662_v9 }
 0x16b   :  { %v666_v18 = vpop.eup %665 }
 0x16c   :  { %605 = vmatprep.subr.bf16.mxu1 %v604_v16  ;;  %v606_v27 = vpack.c.bf16 %v666_v18, %v664_v14  ;;  %v668_v25 = vpop.eup %667 }
 0x16d   :  { %v418_v31 = vmul.f32 %v668_v25, %v414_v26  ;;  %v670_v33 = vpop.eup %669 }
 0x16e   :  { %607 = vmatpush1.bf16.msra.mxu1 %v606_v27  ;;  %v672_v34 = vpop.eup %671 }
 0x16f   :  { %v674_v40 = vpop.eup %673 }
 0x171   :  { %598 = vmatmul.mubr.msk.f32.vlgmr.msra.gmra.mrb[0].mxu1 %vm254_vm5, %v894_v21  ;;  %v500_v21 = vrot.slane %v418_v31, %v948_v51  ;;  %v676_v51 = vpop.eup %675 }
 0x172   :  { %489 = vmatprep.mubr.f32.mxu1 %v778_v1  ;;  %v504_v1 = vrot.slane %v418_v31, %v952_v58 }
 0x175   :  { %599 = vmatmul.mubr.msk.f32.gmra.mrb[2].mxu1 %vm254_vm5, %v899_v22 }
 0x244   :  { %v485_v28 = vpop.f32.mrb[0].mxu1 }
 0x245   :  { %v507_v17 = vadd.f32 %v500_v21, %v485_v28  ;;  %v487_v22 = vpop.f32.mrb[1].mxu1 }
 0x246   :  { %v508_v7 = vadd.f32 %v504_v1, %v487_v22 }
 0x247   :  { %v523_v35 = vmul.f32 %v670_v33, %v507_v17 }
 0x248   :  { %v524_v36 = vmul.f32 %v672_v34, %v508_v7  ;;  %v491_v37 = vpop.f32.mrb[2].mxu1 }
 0x249   :  { %527 = vst [vmem:[#allocation11] sm:$0xff] %v523_v35  ;;  %v509_v38 = vadd.f32 %v500_v21, %v491_v37  ;;  %v493_v39 = vpop.f32.mrb[3].mxu1 }
 0x24a   :  { %528 = vst [vmem:[#allocation11 + $0x8] sm:$0xff] %v524_v36  ;;  %v510_v43 = vadd.f32 %v504_v1, %v493_v39 }
 0x24b   :  { %v525_v42 = vmul.f32 %v674_v40, %v509_v38 }
 0x24c   :  { %v526_v45 = vmul.f32 %v676_v51, %v510_v43  ;;  %v559_v58 = vcombine.high %v509_v38, %v510_v43 }
 0x24d   :  { %529 = vst [vmem:[#allocation11 + $0x10] sm:$0xff] %v525_v42 }
 0x24e   :  { %530 = vst [vmem:[#allocation11 + $0x18] sm:$0xff] %v526_v45  ;;  %v566_v46 = vrot.slane %v559_v58, %v962_v32 }
 0x24f   :  { %754 = shalt.err (!%p751_p0)
}
 0x250   :  { %s755_s29 = scalar_lea.hbm %s1003_s3, 512 }
 0x251   :  { %p756_p1 = scmp.ne.s32.totalorder %s1003_s3, %s755_s29  ;;  %p759_p2 = scmp.lt.u32.totalorder %s755_s29, %s1003_s3 }
 0x253   :  { %p761_p3 = pnand %p759_p2, %p756_p1 }
 0x255   :  { %764 = shalt.err (!%p761_p3)
}
 0x256   :  { %589 = dma.vmem_to_hbm [thread:$0]  %s584_s23, 512, %s1003_s3, [#allocation7], %s773_s24, %s773_s24, %s774_s25   ;;  %v567_v47 = vcombine.high %v566_v46, %v566_v46 }
 0x258   :  { %v574_v48 = vrot.slane %v567_v47, %v962_v32 }
 0x25a   :  { %v575_v41 = vcombine.high %v574_v48, %v574_v48 }
 0x25c   :  { %577 = vst.msk [vmem:[#allocation4] sm:$0x3] %vm854_vm0, %v575_v41 }
 0x25d   :  { %769 = dma.done.wait [#allocation7], 512  }
 0x25e   :  { %770 = vsyncadd [#allocation7], 4294966784 }
 0x25f   :  { %593 = vsyncpa [#allocation6], 1 }
 0x260   :  { %594 = vsyncpa [#allocation9], 1 }
 0x261   :  { %595 = vsyncpa [#allocation7], 1 }

</bundles_post_ra>
